<compile_context>
chip_gen: v5e
topology: v5e:2x2
jax: 0.10.0
libtpu: 0.0.40
codegen_flags: <defaults>
</compile_context>

<pallas_src>
import functools
import math

import jax
import jax.numpy as jnp
from jax.experimental import pallas as pl
from jax.experimental.pallas import tpu as pltpu


def _round_up(x, m):
    return ((x + m - 1) // m) * m


_VMEM_BUDGET_BYTES = 24 << 20   # conservative: fits every generation's scoped VMEM


def fixed_embedding_kernel(idx_ref, table_ref, out_ref, *, chunk):
    # idx_ref  : (TILE, 1)  int32 row indices
    # table_ref: (Kp, Dp)   f32 zero-padded sinusoidal table (same block every step)
    # out_ref  : (TILE, Dp) gathered rows
    tile = out_ref.shape[0]
    kp = table_ref.shape[0]
    n_chunks = tile // chunk
    table = table_ref[...]                       # hoisted out of the chunk loop

    def lookup(idx):
        # idx: (rows, 1) int32  ->  (rows, Dp) rows of the table.
        rows = idx.shape[0]
        cat = jax.lax.broadcasted_iota(jnp.int32, (rows, kp), 1)
        onehot = (cat == idx).astype(jnp.float32)   # small, chunk-sized temp
        # NOTE: out-of-range indices yield a zero row instead of raising like nn.Embedding.
        res = jnp.dot(onehot, table,
                      preferred_element_type=jnp.float32,
                      precision=jax.lax.Precision.HIGHEST)   # exact f32 gather
        return res.astype(out_ref.dtype)

    if n_chunks == 1:
        out_ref[...] = lookup(idx_ref[...])
    else:
        def body(c, carry):
            r0 = pl.multiple_of(c * chunk, chunk)
            out_ref[pl.ds(r0, chunk), :] = lookup(idx_ref[pl.ds(r0, chunk), :])
            return carry
        jax.lax.fori_loop(0, n_chunks, body, 0, unroll=(n_chunks <= 16))


def _choose_tile(n8, tile_rows, kp, dp, chunk_hint=256):
    """Row tile: large (DMA-efficient), VMEM-safe, padding-free when possible,
    and >=2 grid steps on large problems (v7x megacore)."""
    # VMEM words per step: out (double-buffered) + idx (double-buffered, lane-padded
    # to 128) + table + one one-hot chunk.
    words = _VMEM_BUDGET_BYTES // 4
    max_tile = (words - kp * dp - chunk_hint * kp) // (2 * dp + 2 * 128)
    max_tile = max(256, (max_tile // 256) * 256)
    tile_rows = max(8, min(tile_rows, max_tile))

    if n8 <= tile_rows:
        if n8 >= 1024 and n8 % 16 == 0:
            return n8 // 2            # 2 parallel grid steps, still padding-free
        return n8                     # single step, padding-free
    # Large N: prefer the largest 256-multiple <= tile_rows that divides n8 (no
    # padding / no un-pad slice), otherwise fall back to tile_rows and pad.
    hi = (tile_rows // 256) * 256
    lo = max(255, tile_rows // 2 - 1)
    for cand in range(hi, lo, -256):
        if n8 % cand == 0:
            return cand
    return tile_rows


def _chunk_rows(tile):
    """Sub-block size for the in-kernel one-hot; must divide `tile`."""
    if tile <= 512:
        return tile
    for c in range(256, 63, -8):
        if tile % c == 0:
            return c
    return tile   # rare fallback: one-hot stays a few MiB at most with Kp=128


def fixed_embedding_lookup(x_idx, table_padded, d_model, *,
                           tile_rows=4096, out_dtype=jnp.float32):
    """x_idx: integer array of any shape; table_padded: (Kp, Dp) f32, Kp/Dp % 128 == 0.

    Returns table_padded[:, :d_model][x_idx] with shape x_idx.shape + (d_model,).
    """
    kp, dp = table_padded.shape
    orig_shape = x_idx.shape
    n = int(x_idx.size)

    n8 = _round_up(max(n, 1), 8)
    tile = _choose_tile(n8, tile_rows, kp, dp)
    chunk = _chunk_rows(tile)
    n_pad = _round_up(max(n, 1), tile)

    flat = x_idx.reshape(-1).astype(jnp.int32)
    if n_pad != n:
        flat = jnp.concatenate([flat, jnp.zeros((n_pad - n,), jnp.int32)])
    idx = flat[:, None]                                           # (n_pad, 1)

    kernel = functools.partial(fixed_embedding_kernel, chunk=chunk)
    out = pl.pallas_call(
        kernel,
        out_shape=jax.ShapeDtypeStruct((n_pad, dp), out_dtype),
        grid_spec=pltpu.PrefetchScalarGridSpec(
            num_scalar_prefetch=0,
            grid=(n_pad // tile,),
            in_specs=[
                pl.BlockSpec((tile, 1), lambda i: (i, 0)),        # row tile of indices
                pl.BlockSpec((kp, dp), lambda i: (0, 0)),         # table resident in VMEM
            ],
            out_specs=pl.BlockSpec((tile, dp), lambda i: (i, 0)),
        ),
        compiler_params=pltpu.CompilerParams(
            dimension_semantics=("parallel",),                    # megacore / v7x 2 TCs
            vmem_limit_bytes=32 << 20,                            # covers v5e's 16 MiB default
        ),
    )(idx, table_padded)

    if n_pad != n or dp != d_model:
        out = out[:n, :d_model]   # only materializes a copy when padding was unavoidable
    return out.reshape(*orig_shape, d_model)


def fixed_embedding_table(c_in, d_model):
    """Non-trainable sinusoidal table; matches the PyTorch FixedEmbedding init."""
    position = jnp.arange(c_in, dtype=jnp.float32)[:, None]
    div_term = jnp.exp(jnp.arange(0, d_model, 2, dtype=jnp.float32)
                       * -(math.log(10000.0) / d_model))
    ang = position * div_term
    w = jnp.zeros((c_in, d_model), jnp.float32)
    w = w.at[:, 0::2].set(jnp.sin(ang))
    w = w.at[:, 1::2].set(jnp.cos(ang))
    return w


def make_fixed_embedding(c_in, d_model, *, tile_rows=4096, out_dtype=jnp.float32):
    """Build the module once: sinusoidal table + one-time lane-dense zero-padding.

    Returns (forward_fn, table) where forward_fn(x) == table[x].
    """
    table = fixed_embedding_table(c_in, d_model)
    kp = _round_up(c_in, 128)
    dp = _round_up(d_model, 128)
    table_padded = jnp.pad(table, ((0, kp - c_in), (0, dp - d_model)))

    def forward(x_idx):
        return fixed_embedding_lookup(x_idx, table_padded, d_model,
                                      tile_rows=tile_rows, out_dtype=out_dtype)

    return forward, table


if __name__ == "__main__":
    key = jax.random.PRNGKey(0)

    # Small shapes implied by the module: x is (B, L) integer indices (e.g. the hour
    # field of x_mark), table is (c_in, d_model); d_model chosen lane-dense (128).
    B, L = 2, 8
    c_in, d_model = 24, 128

    forward, table = make_fixed_embedding(c_in, d_model)

    x = jax.random.randint(key, (B, L), 0, c_in, dtype=jnp.int32)
    out = forward(x)
    jax.block_until_ready(out)

    ref = table[x]   # nn.Embedding forward with the fixed table (detach is a no-op)
    assert out.shape == (B, L, d_model)
    assert jnp.allclose(out, ref, atol=1e-6, rtol=1e-6), "mismatch vs JAX reference"

    # Also exercise the large-N path: multi-step parallel grid + chunked one-hot loop.
    B2, L2 = 4, 512
    x2 = jax.random.randint(jax.random.PRNGKey(1), (B2, L2), 0, c_in, dtype=jnp.int32)
    out2 = forward(x2)
    jax.block_until_ready(out2)
    assert out2.shape == (B2, L2, d_model)
    assert jnp.allclose(out2, table[x2], atol=1e-6, rtol=1e-6), "mismatch (tiled path)"

    print("KERNEL_OK")
</pallas_src>

<mosaic_0001>
module attributes {stable_mosaic.version = 11 : i64} {
  func.func @fixed_embedding_kernel(%arg0: i32, %arg1: memref<16x1xi32, #tpu.memory_space<vmem>>, %arg2: memref<128x128xf32, #tpu.memory_space<vmem>>, %arg3: memref<16x128xf32, #tpu.memory_space<vmem>>) attributes {dimension_semantics = [#tpu.dimension_semantics<parallel>], iteration_bounds = array<i64: 1>, scalar_prefetch = 0 : i64, scratch_operands = 0 : i64, tpu.core_type = #tpu.core_type<tc>, window_params = [{transform_indices = @transform_0, window_bounds = array<i64: 16, 1>}, {pipeline_mode = #tpu.pipeline_mode<synchronous>, transform_indices = @transform_1, window_bounds = array<i64: 128, 128>}, {transform_indices = @transform_2, window_bounds = array<i64: 16, 128>}]} {
    %c0 = arith.constant 0 : index
    %c0_0 = arith.constant 0 : index
    %0 = vector.load %arg2[%c0, %c0_0] : memref<128x128xf32, #tpu.memory_space<vmem>>, vector<128x128xf32>
    %c0_1 = arith.constant 0 : index
    %c0_2 = arith.constant 0 : index
    %1 = vector.load %arg1[%c0_1, %c0_2] : memref<16x1xi32, #tpu.memory_space<vmem>>, vector<16x1xi32>
    %2 = tpu.iota {dimensions = array<i32: 1>} : vector<16x128xi32>
    %3 = vector.broadcast %1 : vector<16x1xi32> to vector<16x128xi32>
    %4 = arith.cmpi eq, %2, %3 : vector<16x128xi32>
    %5 = arith.extui %4 : vector<16x128xi1> to vector<16x128xi32>
    %6 = arith.sitofp %5 : vector<16x128xi32> to vector<16x128xf32>
    %cst = arith.constant dense<0.000000e+00> : vector<16x128xf32>
    %7 = tpu.matmul %6, %0, %cst {dimension_numbers = #tpu.dot_dimension_numbers<[1], [0], [0], [1], [0, 0, 1, 1], [], []>, precision = #tpu.contract_precision<fp32>} : vector<16x128xf32>, vector<128x128xf32>, vector<16x128xf32> -> vector<16x128xf32>
    %c0_3 = arith.constant 0 : index
    %c0_4 = arith.constant 0 : index
    %8 = vector.load %arg3[%c0_3, %c0_4] : memref<16x128xf32, #tpu.memory_space<vmem>>, vector<16x128xf32>
    tpu.vector_store %arg3[%c0_3, %c0_4], %7 {strides = array<i32>} : memref<16x128xf32, #tpu.memory_space<vmem>>, vector<16x128xf32>,
    return
  }
  func.func @transform_0(%arg0: i32) -> (i32, i32) {
    %c0_i32 = arith.constant 0 : i32
    %c0_i32_0 = arith.constant 0 : i32
    return %arg0, %c0_i32 : i32, i32
  }
  func.func @transform_1(%arg0: i32) -> (i32, i32) {
    %c0_i32 = arith.constant 0 : i32
    %c0_i32_0 = arith.constant 0 : i32
    %c0_i32_1 = arith.constant 0 : i32
    return %c0_i32, %c0_i32_0 : i32, i32
  }
  func.func @transform_2(%arg0: i32) -> (i32, i32) {
    %c0_i32 = arith.constant 0 : i32
    %c0_i32_0 = arith.constant 0 : i32
    return %arg0, %c0_i32 : i32, i32
  }
}

</mosaic_0001>

<bundles_post_ra>
// kernel: tpu_custom_call.1
= control target key start
LH: loop header
LB: loop body
LE: loop exit
PB: predicated region body
PF: predicated region fallthrough
CT: control target
= control target key end

     0   :  { %7 = vsyncpa [#allocation3], 0  ;;  %s789_s0 = inlined_call_operand.vmem [shape: s32[16,1], index: 0, kind: input, shape index: {}]   ;;  %s790_s1 = inlined_call_operand.hbm [shape: f32[128,128], index: 1, kind: input, shape index: {}]   ;;  %s791_s2 = inlined_call_operand.hbm [shape: f32[16,128], index: 2, kind: output, shape index: {}]  }
   0x1   :  { %8 = vsyncpa [#allocation4], 0  ;;  %s15_s11 = sshll.u32 %s790_s1, 4  ;;  %s553_s12 = smov [#allocation2]   ;;  %s16_s11 = int_to_ptr.hbm [resolvable:$true] %s15_s11 }
   0x2   :  { %s17_s13 = sshll.u32 %s553_s12, 4  ;;  %s554_s14 = smov 128   ;;  %s18_s13 = int_to_ptr.vmem [resolvable:$true] %s17_s13 }
   0x3   :  { %s555_s15 = smov 8  }
   0x4   :  { %23 = dma.hbm_to_vmem [thread:$0]  %s16_s11, 2048, %s18_s13, [#allocation3], %s554_s14, %s554_s14, %s555_s15  }
   0x5   :  { %549 = dma.done.wait [#allocation3], 2048  }
   0x6   :  { %550 = vsyncadd [#allocation3], 4294965248  ;;  %v556_v0 = vmov 0   ;;  %v44_v1 = vld [vmem:[%s789_s0] sm:$0xff]  ;;  %v43_v2 = vld [vmem:[#allocation2 + $0x78] sm:$0xff]  ;;  %s440_s22 = sshll.u32 %s791_s2, 4  ;;  %s441_s22 = int_to_ptr.hbm [resolvable:$true] %s440_s22 }
   0x7   :  { %500 = vset.pattern.permute.xlu0 %v556_v0  ;;  %v584_v3 = vand.u32 4294901760, %v43_v2  ;;  %v42_v4 = vld [vmem:[#allocation2 + $0x70] sm:$0xff]  ;;  %v41_v5 = vld [vmem:[#allocation2 + $0x68] sm:$0xff]  ;;  %v40_v6 = vld [vmem:[#allocation2 + $0x60] sm:$0xff] }
   0x8   :  { %49 = vperm.xlu0 %500, %v44_v1   ;;  %v586_v7 = vand.u32 4294901760, %v42_v4  ;;  %v588_v8 = vand.u32 4294901760, %v41_v5  ;;  %v590_v9 = vand.u32 4294901760, %v40_v6  ;;  %v39_v10 = vld [vmem:[#allocation2 + $0x58] sm:$0xff]  ;;  %v38_v11 = vld [vmem:[#allocation2 + $0x50] sm:$0xff]  ;;  %v37_v12 = vld [vmem:[#allocation2 + $0x48] sm:$0xff] }
   0x9   :  { %v110_v13 = vsub.f32 %v43_v2, %v584_v3  ;;  %274 = vmatpush.msra.mxu3 %v584_v3  ;;  %v594_v14 = vand.u32 4294901760, %v39_v10  ;;  %61 = vmatpush.msra.mxu0 %v584_v3  ;;  %v597_v15 = vand.u32 4294901760, %v38_v11  ;;  %v599_v16 = vand.u32 4294901760, %v37_v12  ;;  %v36_v17 = vld [vmem:[#allocation2 + $0x40] sm:$0xff]  ;;  %v45_v25 = vld [vmem:[%s789_s0 + $0x8] sm:$0xff]  ;;  %v35_v35 = vld [vmem:[#allocation2 + $0x38] sm:$0xff] }
   0xa   :  { %v116_v18 = vsub.f32 %v42_v4, %v586_v7  ;;  %v122_v19 = vsub.f32 %v41_v5, %v588_v8  ;;  %v128_v20 = vsub.f32 %v40_v6, %v590_v9  ;;  %v604_v21 = vand.u32 4294901760, %v36_v17  ;;  %v34_v39 = vld [vmem:[#allocation2 + $0x30] sm:$0xff]  ;;  %v33_v40 = vld [vmem:[#allocation2 + $0x28] sm:$0xff]  ;;  %v32_v43 = vld [vmem:[#allocation2 + $0x20] sm:$0xff]  ;;  %s559_s0 = smov [#allocation5]  }
   0xb   :  { %v606_v22 = vand.u32 4294901760, %v110_v13  ;;  %216 = vmatpush.msra.mxu2 %v110_v13  ;;  %276 = vmatpush.msra.mxu3 %v586_v7  ;;  %v134_v23 = vsub.f32 %v39_v10, %v594_v14  ;;  %v140_v24 = vsub.f32 %v38_v11, %v597_v15  ;;  %v146_v29 = vsub.f32 %v37_v12, %v599_v16  ;;  %v31_v50 = vld [vmem:[#allocation2 + $0x18] sm:$0xff]  ;;  %v30_v57 = vld [vmem:[#allocation2 + $0x10] sm:$0xff]  ;;  %v29_v63 = vld [vmem:[#allocation2 + $0x8] sm:$0xff]  ;;  %s438_s19 = sshll.u32 %s559_s0, 4  ;;  %s439_s19 = int_to_ptr.vmem [resolvable:$true] %s438_s19 }
   0xc   :  { %v614_v26 = vand.u32 4294901760, %v116_v18  ;;  %v616_v27 = vand.u32 4294901760, %v122_v19  ;;  %v618_v28 = vand.u32 4294901760, %v128_v20  ;;  %63 = vmatpush.msra.mxu0 %v586_v7  ;;  %v152_v34 = vsub.f32 %v36_v17, %v604_v21  ;;  %v28_v6 = vld [vmem:[#allocation2] sm:$0xff] }
   0xd   :  { %v112_v30 = vsub.f32 %v110_v13, %v606_v22  ;;  %219 = vmatpush.msra.mxu2 %v116_v18  ;;  %v623_v31 = vand.u32 4294901760, %v134_v23  ;;  %278 = vmatpush.msra.mxu3 %v588_v8  ;;  %v631_v38 = vand.u32 4294901760, %v140_v24  ;;  %v634_v42 = vand.u32 4294901760, %v146_v29 }
   0xe   :  { %v118_v32 = vsub.f32 %v116_v18, %v614_v26  ;;  %v124_v33 = vsub.f32 %v122_v19, %v616_v27  ;;  %65 = vmatpush.msra.mxu0 %v588_v8  ;;  %v130_v37 = vsub.f32 %v128_v20, %v618_v28  ;;  %v638_v46 = vand.u32 4294901760, %v35_v35 }
   0xf   :  { %v113_v36 = vand.u32 4294901760, %v112_v30  ;;  %222 = vmatpush.msra.mxu2 %v122_v19  ;;  %280 = vmatpush.msra.mxu3 %v590_v9  ;;  %v136_v45 = vsub.f32 %v134_v23, %v623_v31  ;;  %v641_v47 = vand.u32 4294901760, %v152_v34  ;;  %v644_v48 = vand.u32 4294901760, %v34_v39 }
  0x10   :  { %52 = vperm.xlu0 %500, %v45_v25   ;;  %v119_v41 = vand.u32 4294901760, %v118_v32  ;;  %67 = vmatpush.msra.mxu0 %v590_v9  ;;  %v125_v44 = vand.u32 4294901760, %v124_v33  ;;  %v646_v49 = vand.u32 4294901760, %v33_v40  ;;  %v131_v51 = vand.u32 4294901760, %v130_v37 }
  0x11   :  { %114 = vmatpush.msra.mxu1 %v113_v36  ;;  %225 = vmatpush.msra.mxu2 %v128_v20  ;;  %v142_v52 = vsub.f32 %v140_v24, %v631_v38  ;;  %v158_v53 = vsub.f32 %v35_v35, %v638_v46  ;;  %v650_v54 = vand.u32 4294901760, %v32_v43  ;;  %v148_v55 = vsub.f32 %v146_v29, %v634_v42 }
  0x12   :  { %282 = vmatpush.msra.mxu3 %v594_v14  ;;  %69 = vmatpush.msra.mxu0 %v594_v14  ;;  %v164_v56 = vsub.f32 %v34_v39, %v644_v48  ;;  %v137_v58 = vand.u32 4294901760, %v136_v45  ;;  %v170_v60 = vsub.f32 %v33_v40, %v646_v49  ;;  %v659_v61 = vand.u32 4294901760, %v31_v50 }
  0x13   :  { %120 = vmatpush.msra.mxu1 %v119_v41  ;;  %228 = vmatpush.msra.mxu2 %v134_v23  ;;  %v656_v59 = vand.u32 4294901760, %v158_v53  ;;  %v154_v62 = vsub.f32 %v152_v34, %v641_v47  ;;  %v143_v0 = vand.u32 4294901760, %v142_v52  ;;  %v176_v2 = vsub.f32 %v32_v43, %v650_v54 }
  0x14   :  { %284 = vmatpush.msra.mxu3 %v597_v15  ;;  %71 = vmatpush.msra.mxu0 %v597_v15  ;;  %v664_v1 = vand.u32 4294901760, %v164_v56  ;;  %v667_v4 = vand.u32 4294901760, %v30_v57  ;;  %v149_v5 = vand.u32 4294901760, %v148_v55  ;;  %v672_v11 = vand.u32 4294901760, %v170_v60 }
  0x15   :  { %126 = vmatpush.msra.mxu1 %v125_v44  ;;  %231 = vmatpush.msra.mxu2 %v140_v24  ;;  %v160_v10 = vsub.f32 %v158_v53, %v656_v59  ;;  %v182_v12 = vsub.f32 %v31_v50, %v659_v61  ;;  %v675_v13 = vand.u32 4294901760, %v29_v63  ;;  %v155_v17 = vand.u32 4294901760, %v154_v62 }
  0x16   :  { %286 = vmatpush.msra.mxu3 %v599_v16  ;;  %73 = vmatpush.msra.mxu0 %v599_v16  ;;  %v166_v18 = vsub.f32 %v164_v56, %v664_v1  ;;  %v680_v19 = vand.u32 4294901760, %v176_v2  ;;  %v188_v20 = vsub.f32 %v30_v57, %v667_v4  ;;  %v683_v23 = vand.u32 4294901760, %v28_v6 }
  0x17   :  { %132 = vmatpush.msra.mxu1 %v131_v51  ;;  %234 = vmatpush.msra.mxu2 %v146_v29  ;;  %v161_v24 = vand.u32 4294901760, %v160_v10  ;;  %v172_v25 = vsub.f32 %v170_v60, %v672_v11  ;;  %v688_v29 = vand.u32 4294901760, %v182_v12  ;;  %v194_v30 = vsub.f32 %v29_v63, %v675_v13 }
  0x18   :  { %288 = vmatpush.msra.mxu3 %v604_v21  ;;  %75 = vmatpush.msra.mxu0 %v604_v21  ;;  %v167_v32 = vand.u32 4294901760, %v166_v18  ;;  %v178_v33 = vsub.f32 %v176_v2, %v680_v19  ;;  %v200_v35 = vsub.f32 %v28_v6, %v683_v23 }
  0x19   :  { %138 = vmatpush.msra.mxu1 %v137_v58  ;;  %237 = vmatpush.msra.mxu2 %v152_v34  ;;  %v694_v34 = vand.u32 4294901760, %v188_v20  ;;  %v173_v36 = vand.u32 4294901760, %v172_v25  ;;  %v184_v37 = vsub.f32 %v182_v12, %v688_v29  ;;  %v700_v39 = vand.u32 4294901760, %v194_v30 }
  0x1a   :  { %290 = vmatpush.msra.mxu3 %v638_v46  ;;  %77 = vmatpush.msra.mxu0 %v638_v46  ;;  %v179_v40 = vand.u32 4294901760, %v178_v33  ;;  %v705_v43 = vand.u32 4294901760, %v200_v35 }
  0x1b   :  { %144 = vmatpush.msra.mxu1 %v143_v0  ;;  %240 = vmatpush.msra.mxu2 %v158_v53  ;;  %v190_v41 = vsub.f32 %v188_v20, %v694_v34  ;;  %v185_v44 = vand.u32 4294901760, %v184_v37  ;;  %v196_v45 = vsub.f32 %v194_v30, %v700_v39 }
  0x1c   :  { %292 = vmatpush.msra.mxu3 %v644_v48  ;;  %79 = vmatpush.msra.mxu0 %v644_v48  ;;  %v202_v51 = vsub.f32 %v200_v35, %v705_v43 }
  0x1d   :  { %150 = vmatpush.msra.mxu1 %v149_v5  ;;  %243 = vmatpush.msra.mxu2 %v164_v56  ;;  %v191_v50 = vand.u32 4294901760, %v190_v41  ;;  %v197_v52 = vand.u32 4294901760, %v196_v45 }
  0x1e   :  { %294 = vmatpush.msra.mxu3 %v646_v49  ;;  %81 = vmatpush.msra.mxu0 %v646_v49  ;;  %v203_v53 = vand.u32 4294901760, %v202_v51 }
  0x1f   :  { %156 = vmatpush.msra.mxu1 %v155_v17  ;;  %246 = vmatpush.msra.mxu2 %v170_v60 }
  0x20   :  { %296 = vmatpush.msra.mxu3 %v650_v54  ;;  %83 = vmatpush.msra.mxu0 %v650_v54 }
  0x21   :  { %162 = vmatpush.msra.mxu1 %v161_v24  ;;  %249 = vmatpush.msra.mxu2 %v176_v2 }
  0x22   :  { %298 = vmatpush.msra.mxu3 %v659_v61  ;;  %85 = vmatpush.msra.mxu0 %v659_v61 }
  0x23   :  { %168 = vmatpush.msra.mxu1 %v167_v32  ;;  %252 = vmatpush.msra.mxu2 %v182_v12 }
  0x24   :  { %300 = vmatpush.msra.mxu3 %v667_v4  ;;  %87 = vmatpush.msra.mxu0 %v667_v4 }
  0x25   :  { %174 = vmatpush.msra.mxu1 %v173_v36  ;;  %255 = vmatpush.msra.mxu2 %v188_v20 }
  0x26   :  { %302 = vmatpush.msra.mxu3 %v675_v13  ;;  %89 = vmatpush.msra.mxu0 %v675_v13 }
  0x27   :  { %180 = vmatpush.msra.mxu1 %v179_v40  ;;  %258 = vmatpush.msra.mxu2 %v194_v30 }
  0x28   :  { %304 = vmatpush.msra.mxu3 %v683_v23  ;;  %91 = vmatpush.msra.mxu0 %v683_v23 }
  0x29   :  { %186 = vmatpush.msra.mxu1 %v185_v44  ;;  %261 = vmatpush.msra.mxu2 %v200_v35 }
  0x2a   :  { %477 = vmatpush.msrb.mxu3 %v584_v3  ;;  %321 = vmatpush.msrb.mxu0 %v606_v22 }
  0x2b   :  { %461 = vmatpush.msrb.mxu2 %v606_v22  ;;  %192 = vmatpush.msra.mxu1 %v191_v50 }
  0x2c   :  { %478 = vmatpush.msrb.mxu3 %v586_v7  ;;  %325 = vmatpush.msrb.mxu0 %v614_v26 }
  0x2d   :  { %462 = vmatpush.msrb.mxu2 %v614_v26  ;;  %198 = vmatpush.msra.mxu1 %v197_v52 }
  0x2e   :  { %479 = vmatpush.msrb.mxu3 %v588_v8  ;;  %329 = vmatpush.msrb.mxu0 %v616_v27 }
  0x2f   :  { %463 = vmatpush.msrb.mxu2 %v616_v27  ;;  %204 = vmatpush.msra.mxu1 %v203_v53 }
  0x30   :  { %480 = vmatpush.msrb.mxu3 %v590_v9  ;;  %333 = vmatpush.msrb.mxu0 %v618_v28 }
  0x31   :  { %392 = vmatpush.msrb.mxu1 %v584_v3  ;;  %464 = vmatpush.msrb.mxu2 %v618_v28  ;;  %v46_v3 = vlaneseq }
  0x32   :  { %481 = vmatpush.msrb.mxu3 %v594_v14  ;;  %337 = vmatpush.msrb.mxu0 %v623_v31 }
  0x33   :  { %394 = vmatpush.msrb.mxu1 %v586_v7  ;;  %465 = vmatpush.msrb.mxu2 %v623_v31  ;;  %v47_v7 = vand.u32 127, %v46_v3 }
  0x34   :  { %482 = vmatpush.msrb.mxu3 %v597_v15  ;;  %341 = vmatpush.msrb.mxu0 %v631_v38 }
  0x35   :  { %396 = vmatpush.msrb.mxu1 %v588_v8  ;;  %466 = vmatpush.msrb.mxu2 %v631_v38 }
  0x36   :  { %483 = vmatpush.msrb.mxu3 %v599_v16  ;;  %345 = vmatpush.msrb.mxu0 %v634_v42 }
  0x37   :  { %398 = vmatpush.msrb.mxu1 %v590_v9  ;;  %467 = vmatpush.msrb.mxu2 %v634_v42  ;;  %v557_v9 = vmov 1.0  }
  0x38   :  { %484 = vmatpush.msrb.mxu3 %v604_v21  ;;  %349 = vmatpush.msrb.mxu0 %v641_v47 }
  0x39   :  { %400 = vmatpush.msrb.mxu1 %v594_v14  ;;  %468 = vmatpush.msrb.mxu2 %v641_v47  ;;  %v558_v14 = vmov 0.0  }
  0x3a   :  { %485 = vmatpush.msrb.mxu3 %v638_v46  ;;  %353 = vmatpush.msrb.mxu0 %v656_v59 }
  0x3b   :  { %402 = vmatpush.msrb.mxu1 %v597_v15  ;;  %469 = vmatpush.msrb.mxu2 %v656_v59 }
  0x3c   :  { %486 = vmatpush.msrb.mxu3 %v644_v48  ;;  %357 = vmatpush.msrb.mxu0 %v664_v1 }
  0x3d   :  { %404 = vmatpush.msrb.mxu1 %v599_v16  ;;  %470 = vmatpush.msrb.mxu2 %v664_v1 }
  0x3e   :  { %487 = vmatpush.msrb.mxu3 %v646_v49  ;;  %361 = vmatpush.msrb.mxu0 %v672_v11 }
  0x3f   :  { %406 = vmatpush.msrb.mxu1 %v604_v21  ;;  %471 = vmatpush.msrb.mxu2 %v672_v11 }
  0x40   :  { %488 = vmatpush.msrb.mxu3 %v650_v54  ;;  %365 = vmatpush.msrb.mxu0 %v680_v19 }
  0x41   :  { %408 = vmatpush.msrb.mxu1 %v638_v46  ;;  %472 = vmatpush.msrb.mxu2 %v680_v19 }
  0x42   :  { %489 = vmatpush.msrb.mxu3 %v659_v61  ;;  %369 = vmatpush.msrb.mxu0 %v688_v29 }
  0x43   :  { %410 = vmatpush.msrb.mxu1 %v644_v48  ;;  %473 = vmatpush.msrb.mxu2 %v688_v29 }
  0x44   :  { %490 = vmatpush.msrb.mxu3 %v667_v4  ;;  %373 = vmatpush.msrb.mxu0 %v694_v34 }
  0x45   :  { %412 = vmatpush.msrb.mxu1 %v646_v49  ;;  %474 = vmatpush.msrb.mxu2 %v694_v34 }
  0x46   :  { %491 = vmatpush.msrb.mxu3 %v675_v13  ;;  %377 = vmatpush.msrb.mxu0 %v700_v39 }
  0x47   :  { %414 = vmatpush.msrb.mxu1 %v650_v54  ;;  %475 = vmatpush.msrb.mxu2 %v700_v39 }
  0x48   :  { %492 = vmatpush.msrb.mxu3 %v683_v23  ;;  %381 = vmatpush.msrb.mxu0 %v705_v43 }
  0x49   :  { %416 = vmatpush.msrb.mxu1 %v659_v61  ;;  %476 = vmatpush.msrb.mxu2 %v705_v43 }
  0x4b   :  { %418 = vmatpush.msrb.mxu1 %v667_v4 }
  0x4d   :  { %420 = vmatpush.msrb.mxu1 %v675_v13 }
  0x4f   :  { %422 = vmatpush.msrb.mxu1 %v683_v23 }
  0x7a   :  { %v50_v8 = vpop.permute.xlu0 %49 }
  0x7b   :  { %vm54_vm0 = vcmp.eq.s32.totalorder %v47_v7, %v50_v8 }
  0x7c   :  { %455 = vmatmul.msk.f32.vlgmr.msra.gmra.mxu1 %vm54_vm0, %v557_v9  ;;  %v453_v15 = vsel %vm54_vm0, 1.0, %v558_v14 }
  0x7d   :  { %v93_v16 = vsub.f32 %v453_v15, %v453_v15 }
  0x7f   :  { %264 = vmatmul.f32.vlgmr.msra.gmra.mxu2 %v93_v16  ;;  %v94_v21 = vand.u32 4294901760, %v93_v16 }
  0x81   :  { %308 = vmatmul.f32.vlgmr.msra.gmra.mxu3 %v94_v21  ;;  %v95_v22 = vsub.f32 %v93_v16, %v94_v21 }
  0x82   :  { %v53_v26 = vpop.permute.xlu0 %52 }
  0x83   :  { %vm55_vm1 = vcmp.eq.s32.totalorder %v47_v7, %v53_v26  ;;  %v96_v27 = vand.u32 4294901760, %v95_v22 }
  0x84   :  { %456 = vmatmul.msk.f32.gmra.mxu1 %vm55_vm1, %v557_v9  ;;  %v454_v28 = vsel %vm55_vm1, 1.0, %v558_v14 }
  0x85   :  { %97 = vmatmul.f32.vlgmr.msra.gmra.mxu0 %v96_v27  ;;  %v101_v31 = vsub.f32 %v454_v28, %v454_v28 }
  0x87   :  { %269 = vmatmul.f32.gmra.mxu2 %v101_v31  ;;  %v102_v38 = vand.u32 4294901760, %v101_v31 }
  0x89   :  { %314 = vmatmul.f32.gmra.mxu3 %v102_v38  ;;  %v103_v42 = vsub.f32 %v101_v31, %v102_v38 }
  0x8b   :  { %v104_v46 = vand.u32 4294901760, %v103_v42 }
  0x8c   :  { %459 = vmatmul.msk.f32.vlgmr.msrb.gmra.mxu1 %vm54_vm0, %v557_v9 }
  0x8d   :  { %105 = vmatmul.f32.gmra.mxu0 %v104_v46 }
  0x8f   :  { %458 = vmatmul.msk.f32.vlgmr.msrb.gmra.mxu2 %vm55_vm1, %v557_v9 }
  0x91   :  { %460 = vmatmul.msk.f32.vlgmr.msrb.gmra.mxu3 %vm55_vm1, %v557_v9 }
  0x95   :  { %457 = vmatmul.msk.f32.vlgmr.msrb.gmra.mxu0 %vm54_vm0, %v557_v9 }
  0xf9   :  { %v207_v47 = vpop.f32.mrf.mxu1 }
 0x101   :  { %v211_v55 = vpop.f32.mrf.mxu1 }
 0x102   :  { %v98_v48 = vpop.f32.mrf.mxu0  ;;  %v265_v49 = vpop.f32.mrf.mxu2 }
 0x103   :  { %v208_v56 = vadd.f32 %v207_v47, %v98_v48 }
 0x104   :  { %v309_v54 = vpop.f32.mrf.mxu3 }
 0x105   :  { %v266_v61 = vadd.f32 %v265_v49, %v208_v56 }
 0x107   :  { %v310_v63 = vadd.f32 %v309_v54, %v266_v61 }
 0x109   :  { %v425_v6 = vpop.f32.mrf.mxu1 }
 0x10a   :  { %v106_v57 = vpop.f32.mrf.mxu0  ;;  %v270_v58 = vpop.f32.mrf.mxu2 }
 0x10b   :  { %v212_v59 = vadd.f32 %v211_v55, %v106_v57 }
 0x10c   :  { %v315_v60 = vpop.f32.mrf.mxu3 }
 0x10d   :  { %v271_v62 = vadd.f32 %v270_v58, %v212_v59 }
 0x10f   :  { %v316_v0 = vadd.f32 %v315_v60, %v271_v62 }
 0x112   :  { %v384_v1 = vpop.f32.mrf.mxu0  ;;  %v388_v2 = vpop.f32.mrf.mxu2 }
 0x113   :  { %v385_v4 = vadd.f32 %v384_v1, %v310_v63  ;;  %v389_v5 = vadd.f32 %v388_v2, %v316_v0 }
 0x114   :  { %v429_v10 = vpop.f32.mrf.mxu3 }
 0x115   :  { %v426_v11 = vadd.f32 %v425_v6, %v385_v4  ;;  %v430_v12 = vadd.f32 %v429_v10, %v389_v5 }
 0x117   :  { %432 = vst [vmem:[#allocation5] sm:$0xff] %v426_v11 }
 0x118   :  { %433 = vst [vmem:[#allocation5 + $0x8] sm:$0xff] %v430_v12 }
 0x119   :  { %446 = dma.vmem_to_hbm [thread:$0]  %s439_s19, 256, %s441_s22, [#allocation4], %s554_s14, %s554_s14, %s555_s15  }
 0x11a   :  { %551 = dma.done.wait [#allocation4], 256  }
 0x11b   :  { %552 = vsyncadd [#allocation4], 4294967040 }
 0x11c   :  { %451 = vsyncpa [#allocation3], 1 }
 0x11d   :  { %452 = vsyncpa [#allocation4], 1 }

</bundles_post_ra>
